<compile_context>
chip_gen: v6e
topology: v6e:2x2x1
jax: 0.10.0
libtpu: 0.0.40
codegen_flags: <defaults>
</compile_context>

<pallas_src>
import math

import jax
import jax.numpy as jnp
from jax.experimental import pallas as pl
from jax.experimental.pallas import tpu as pltpu


# ---------------------------------------------------------------------------
# Pallas kernel: pure broadcast-multiply of a (R, S) x-slab by a (R, 1) keep mask.
# ---------------------------------------------------------------------------
def _noscale_dropout_kernel(mask_ref, x_ref, o_ref):
    # mask_ref: (R, 1) in x dtype (0.0 or 1.0); x_ref/o_ref: (R, S), S = full lane axis.
    o_ref[...] = x_ref[...] * mask_ref[...]


def _choose_row_block(rows, row_bytes, target_bytes=2 << 20):
    """Pick a multiple-of-8 row-tile that keeps a block ~<= 2 MiB and the grid >= 2 steps."""
    r = max(8, (target_bytes // max(row_bytes, 1)) // 8 * 8)
    if rows > 8:
        # keep the grid splittable across v7x's two TensorCores when possible
        half = max(8, pl.cdiv(pl.cdiv(rows, 2), 8) * 8)
        r = min(r, half)
    return min(r, rows)


# ---------------------------------------------------------------------------
# Wrapper: flatten (N, n_atoms, *rest) -> (rows, S) lane-dense rows, tile rows.
# ---------------------------------------------------------------------------
def noscale_dropout_apply(x, mask):
    """x: (N, n_atoms, *rest); mask: (N, n_atoms) keep mask (0/1) in any float dtype."""
    N, A = x.shape[0], x.shape[1]
    rows = N * A
    S = math.prod(x.shape[2:]) if x.ndim > 2 else 1
    xf = x.reshape(rows, S)
    mf = mask.astype(x.dtype).reshape(rows, 1)

    R = _choose_row_block(rows, S * xf.dtype.itemsize)
    grid = (pl.cdiv(rows, R),)

    out = pl.pallas_call(
        _noscale_dropout_kernel,
        out_shape=jax.ShapeDtypeStruct((rows, S), x.dtype),
        grid=grid,
        in_specs=[
            pl.BlockSpec((R, 1), lambda i: (i, 0)),   # keep mask, one scalar per row
            pl.BlockSpec((R, S), lambda i: (i, 0)),   # x slab, full lane axis
        ],
        out_specs=pl.BlockSpec((R, S), lambda i: (i, 0)),
        compiler_params=pltpu.CompilerParams(dimension_semantics=("parallel",)),
        cost_estimate=pl.CostEstimate(
            flops=x.size, transcendentals=0,
            bytes_accessed=2 * x.size * x.dtype.itemsize + rows * x.dtype.itemsize),
    )(mf, xf)
    return out.reshape(x.shape)


# ---------------------------------------------------------------------------
# Thin module-style wrapper mirroring the PyTorch class.
# ---------------------------------------------------------------------------
class NoScaleDropout:
    """Dropout without rescaling and a variable (randomly sampled) dropout rate."""

    def __init__(self, rate_max):
        self.rate_max = float(rate_max)
        self.training = True

    def __call__(self, x, key):
        if not self.training or self.rate_max == 0:
            return x                                   # identity path: no kernel, like PyTorch
        N, A = x.shape[0], x.shape[1]
        k_rate, k_mask = jax.random.split(key)
        rate = jax.random.uniform(k_rate, (), jnp.float32, 0.0, self.rate_max)
        keep = jax.random.bernoulli(k_mask, 1.0 - rate, (N, A)).astype(x.dtype)
        return noscale_dropout_apply(x, keep)


# ---------------------------------------------------------------------------
if __name__ == "__main__":
    N, n_atoms, D, H, W = 2, 8, 8, 8, 8               # S = D*H*W = 512 (lane-dense)
    rate_max = 0.5

    key = jax.random.PRNGKey(0)
    kx, k_rate, k_mask = jax.random.split(key, 3)
    x = jax.random.normal(kx, (N, n_atoms, D, H, W), jnp.float32)

    # training path: sample rate and keep mask (tiny glue), run the streaming Pallas kernel
    rate = jax.random.uniform(k_rate, (), jnp.float32, 0.0, rate_max)
    keep = jax.random.bernoulli(k_mask, 1.0 - rate, (N, n_atoms)).astype(x.dtype)

    fwd = jax.jit(noscale_dropout_apply)
    out = jax.block_until_ready(fwd(x, keep))

    # checks: shape, exact per-(batch, atom) keep/drop behavior, no rescaling.
    assert out.shape == x.shape, out.shape
    assert bool(jnp.all(jnp.isfinite(out)))
    ref = x * keep[:, :, None, None, None]
    assert bool(jnp.all(out == ref))
    of = out.reshape(N, n_atoms, -1)
    xf = x.reshape(N, n_atoms, -1)
    row_kept = jnp.all(of == xf, axis=-1)
    row_zero = jnp.all(of == 0.0, axis=-1)
    assert bool(jnp.all(row_kept | row_zero))

    # eval / rate_max == 0 paths are exact identity, like the PyTorch module.
    layer = NoScaleDropout(rate_max)
    layer.training = False
    assert bool(jnp.all(layer(x, key) == x))
    layer_zero = NoScaleDropout(0.0)
    assert bool(jnp.all(layer_zero(x, key) == x))

    # training path through the module wrapper also runs the kernel
    layer_train = NoScaleDropout(rate_max)
    out2 = jax.block_until_ready(layer_train(x, key))
    assert out2.shape == x.shape

    print("KERNEL_OK")
</pallas_src>

<mosaic_0001>
module attributes {stable_mosaic.version = 11 : i64} {
  func.func @_noscale_dropout_kernel(%arg0: i32, %arg1: memref<8x1xf32, #tpu.memory_space<vmem>>, %arg2: memref<8x512xf32, #tpu.memory_space<vmem>>, %arg3: memref<8x512xf32, #tpu.memory_space<vmem>>) attributes {dimension_semantics = [#tpu.dimension_semantics<parallel>], iteration_bounds = array<i64: 2>, scalar_prefetch = 0 : i64, scratch_operands = 0 : i64, tpu.core_type = #tpu.core_type<tc>, window_params = [{transform_indices = @transform_0, window_bounds = array<i64: 8, 1>}, {transform_indices = @transform_1, window_bounds = array<i64: 8, 512>}, {transform_indices = @transform_2, window_bounds = array<i64: 8, 512>}]} {
    %c0 = arith.constant 0 : index
    %c0_0 = arith.constant 0 : index
    %0 = vector.load %arg2[%c0, %c0_0] : memref<8x512xf32, #tpu.memory_space<vmem>>, vector<8x512xf32>
    %c0_1 = arith.constant 0 : index
    %c0_2 = arith.constant 0 : index
    %1 = vector.load %arg1[%c0_1, %c0_2] : memref<8x1xf32, #tpu.memory_space<vmem>>, vector<8x1xf32>
    %2 = vector.broadcast %1 : vector<8x1xf32> to vector<8x512xf32>
    %3 = arith.mulf %0, %2 : vector<8x512xf32>
    %c0_3 = arith.constant 0 : index
    %c0_4 = arith.constant 0 : index
    %4 = vector.load %arg3[%c0_3, %c0_4] : memref<8x512xf32, #tpu.memory_space<vmem>>, vector<8x512xf32>
    tpu.vector_store %arg3[%c0_3, %c0_4], %3 {strides = array<i32>} : memref<8x512xf32, #tpu.memory_space<vmem>>, vector<8x512xf32>,
    return
  }
  func.func @transform_0(%arg0: i32) -> (i32, i32) {
    %c0_i32 = arith.constant 0 : i32
    %c0_i32_0 = arith.constant 0 : i32
    return %arg0, %c0_i32 : i32, i32
  }
  func.func @transform_1(%arg0: i32) -> (i32, i32) {
    %c0_i32 = arith.constant 0 : i32
    %c0_i32_0 = arith.constant 0 : i32
    return %arg0, %c0_i32 : i32, i32
  }
  func.func @transform_2(%arg0: i32) -> (i32, i32) {
    %c0_i32 = arith.constant 0 : i32
    %c0_i32_0 = arith.constant 0 : i32
    return %arg0, %c0_i32 : i32, i32
  }
}

</mosaic_0001>

<bundles_post_ra>
// kernel: noscale_dropout_apply.1
= control target key start
LH: loop header
LB: loop body
LE: loop exit
PB: predicated region body
PF: predicated region fallthrough
CT: control target
= control target key end

     0   :  { %s294_s9 = smov 0   ;;  %s314_s0 = inlined_call_operand.vmem [shape: f32[16,1], index: 0, kind: input, shape index: {}]   ;;  %s315_s1 = inlined_call_operand.vmem [shape: f32[16,512], index: 1, kind: input, shape index: {}]   ;;  %s316_s2 = inlined_call_operand.vmem [shape: f32[16,512], index: 2, kind: output, shape index: {}]  }
   0x1 LB: > { %s246_s10 = sadd.s32 4294967295, %s276_s9   ;;  %p250_p0 = scmp.ge.s32.totalorder %s276_s9, 1  ;;  %s276_s9 = sphi %s294_s9, %s12_s9  }
   0x2   : > { %p121_p1 = scmp.lt.s32.totalorder %s276_s9, 3 }
   0x4   : > { %p122_p2 = pnand %p250_p0, %p121_p1 }
   0x5   : > { %p147_p3 = scmp.lt.s32.totalorder (!%p122_p2), %s246_s10, 1 }
   0x6   : > { %125 = sbr.rel (%p122_p2) target bundleno = 143 (0x8f), region = 28 }
   0xb   : > { %v278_v0 = vmov 0   ;;  %s318_s10 = smov (!%p147_p3, %s246_s10), 1 }
   0xc   : > { %269 = vset.pattern.permute.xlu0 %v278_v0  ;;  %s251_s11 = sshll.u32 %s318_s10, 3  ;;  %s258_s15 = sshll.u32 %s318_s10, 5 }
   0xd   : > { %s150_s14 = scalar_lea.vmem %s314_s0, %s251_s11  ;;  %s155_s18 = scalar_lea.vmem %s315_s1, %s258_s15 }
   0xe   : > { %v165_v1 = vld [vmem:[%s150_s14] sm:$0xff]  ;;  %v162_v3 = vld [vmem:[%s155_s18 + $0x8] sm:$0xff]  ;;  %v163_v4 = vld [vmem:[%s155_s18 + $0x10] sm:$0xff]  ;;  %s160_s21 = scalar_lea.vmem %s316_s2, %s258_s15 }
   0xf   : > { %168 = vperm.xlu0 %269, %v165_v1   ;;  %v161_v2 = vld [vmem:[%s155_s18] sm:$0xff]  ;;  %v164_v5 = vld [vmem:[%s155_s18 + $0x18] sm:$0xff] }
  0x8a   : > { %v169_v6 = vpop.permute.xlu0 %168 }
  0x8b   : > { %v171_v7 = vmul.f32 %v169_v6, %v161_v2  ;;  %v172_v8 = vmul.f32 %v169_v6, %v162_v3  ;;  %v173_v9 = vmul.f32 %v169_v6, %v163_v4  ;;  %v174_v10 = vmul.f32 %v169_v6, %v164_v5 }
  0x8d   : > { %175 = vst [vmem:[%s160_s21] sm:$0xff] %v171_v7  ;;  %176 = vst [vmem:[%s160_s21 + $0x8] sm:$0xff] %v172_v8 }
  0x8e   : > { %177 = vst [vmem:[%s160_s21 + $0x10] sm:$0xff] %v173_v9  ;;  %178 = vst [vmem:[%s160_s21 + $0x18] sm:$0xff] %v174_v10 }
  0x8f PF: > { %s12_s9 = sadd.s32 1, %s276_s9  }
  0x90   : > { %p9_p4 = scmp.ge.s32.totalorder %s12_s9, 4  }
  0x92   :  { %11 = sbr.rel (!%p9_p4) target bundleno = 1 (0x1), region = 61 }

</bundles_post_ra>
